<compile_context>
chip_gen: v7x
topology: tpu7x:2x2x1
jax: 0.10.0
libtpu: 0.0.40
codegen_flags: <defaults>
</compile_context>

<pallas_src>
import jax
import jax.numpy as jnp
from jax.experimental import pallas as pl
from jax.experimental.pallas import tpu as pltpu


def wavegin_kernel(a_ref, feat_ref, wcm_ref, bcm_ref, out_ref, acc_ref):
    k = pl.program_id(1)

    # Init accumulator at the first K step.
    @pl.when(k == 0)
    def _():
        acc_ref[...] = jnp.zeros_like(acc_ref)

    # Aggregation (sum reducer + folded (1+eps)*I): [TN, TK] @ [TK, F_in] -> f32 acc.
    acc_ref[...] += jnp.dot(a_ref[...], feat_ref[...],
                            preferred_element_type=jnp.float32)

    # Finalize: fused gating matmul + sigmoid/tanh product.
    @pl.when(k == pl.num_programs(1) - 1)
    def _():
        h = acc_ref[...].astype(wcm_ref.dtype)          # bf16 for the MXU
        z = jnp.dot(h, wcm_ref[...], preferred_element_type=jnp.float32)
        z = z + bcm_ref[...]                            # f32 bias, broadcast over rows
        f_out = out_ref.shape[1]
        coff = jax.nn.sigmoid(z[:, :f_out])
        msg = jnp.tanh(z[:, f_out:])
        out_ref[...] = (coff * msg).astype(out_ref.dtype)
        # TODO(synk): residual branch (res_fc) omitted — module default residual=False.


def wavegin_forward(adj, feat, w_coff, b_coff, w_msg, b_msg, eps, *,
                    tile_n=128, tile_k=128, compute_dtype=jnp.bfloat16):
    """WaveGIN forward. tile_n: row tile (use 256 on v6e/v7x for large N);
    tile_k: contraction tile over source nodes."""
    N, f_in = feat.shape
    f_out = w_coff.shape[1]

    if N % tile_n != 0 or N % tile_k != 0:
        raise ValueError(f"N={N} must be divisible by tile_n={tile_n} and tile_k={tile_k}")
    if f_in % 128 != 0 or f_out % 128 != 0:
        raise ValueError("F_in and F_out must be multiples of 128 (pad on host otherwise)")

    # Fold (1 + eps) * feat into the aggregation: A' = A + (1+eps)*I.
    adj_eps = (adj + (1.0 + eps) * jnp.eye(N, dtype=adj.dtype)).astype(compute_dtype)
    feat_c = feat.astype(compute_dtype)

    # Fuse the two gating linears into one wide matmul.
    w_cm = jnp.concatenate([w_coff, w_msg], axis=1).astype(compute_dtype)       # [F_in, 2*F_out]
    b_cm = jnp.concatenate([b_coff, b_msg], axis=0).reshape(1, 2 * f_out)
    b_cm = b_cm.astype(jnp.float32)                                             # [1, 2*F_out]

    grid = (N // tile_n, N // tile_k)

    itemsize = jnp.dtype(compute_dtype).itemsize
    out_itemsize = jnp.dtype(feat.dtype).itemsize
    cost = pl.CostEstimate(
        flops=2 * N * N * f_in + 2 * N * f_in * (2 * f_out),
        transcendentals=2 * N * f_out,
        bytes_accessed=(N * N * itemsize                          # adjacency, read once
                        + (N // tile_n) * N * f_in * itemsize     # feat re-read per row tile
                        + f_in * 2 * f_out * itemsize             # fused weights
                        + 2 * f_out * 4                           # fused bias
                        + N * f_out * out_itemsize),              # output
    )

    return pl.pallas_call(
        wavegin_kernel,
        out_shape=jax.ShapeDtypeStruct((N, f_out), feat.dtype),
        grid_spec=pltpu.PrefetchScalarGridSpec(
            num_scalar_prefetch=0,
            grid=grid,
            in_specs=[
                pl.BlockSpec((tile_n, tile_k), lambda i, k: (i, k)),     # A' tile
                pl.BlockSpec((tile_k, f_in), lambda i, k: (k, 0)),       # feat K-tile
                pl.BlockSpec((f_in, 2 * f_out), lambda i, k: (0, 0)),    # fused Wc|Wm
                pl.BlockSpec((1, 2 * f_out), lambda i, k: (0, 0)),       # fused bc|bm
            ],
            out_specs=pl.BlockSpec((tile_n, f_out), lambda i, k: (i, 0)),
            scratch_shapes=[pltpu.VMEM((tile_n, f_in), jnp.float32)],    # h accumulator
        ),
        compiler_params=pltpu.CompilerParams(
            dimension_semantics=("parallel", "arbitrary")),
        cost_estimate=cost,
    )(adj_eps, feat_c, w_cm, b_cm)


def wavegin_ref(adj, feat, w_coff, b_coff, w_msg, b_msg, eps,
                compute_dtype=jnp.float32):
    """Pure-JAX reference mirroring the kernel's dtype strategy.
    compute_dtype=float32 reproduces the PyTorch module exactly."""
    n = adj.shape[0]
    a = (adj + (1.0 + eps) * jnp.eye(n, dtype=adj.dtype)).astype(compute_dtype)
    x = feat.astype(compute_dtype)
    h = jnp.dot(a, x, preferred_element_type=jnp.float32)
    hc = h.astype(compute_dtype)
    wc = w_coff.astype(compute_dtype)
    wm = w_msg.astype(compute_dtype)
    coff = jax.nn.sigmoid(jnp.dot(hc, wc, preferred_element_type=jnp.float32) + b_coff)
    msg = jnp.tanh(jnp.dot(hc, wm, preferred_element_type=jnp.float32) + b_msg)
    return (coff * msg).astype(feat.dtype)


if __name__ == "__main__":
    key = jax.random.PRNGKey(0)
    N, F_IN, F_OUT = 256, 128, 128
    INIT_EPS = 0.0  # module default (buffer, not learned)

    k_adj, k_feat, k_wc, k_bc, k_wm, k_bm = jax.random.split(key, 6)

    # Dense random binary adjacency, sum aggregator over neighbors.
    adj = (jax.random.uniform(k_adj, (N, N)) < 0.1).astype(jnp.float32)
    feat = jax.random.normal(k_feat, (N, F_IN), dtype=jnp.float32)

    # nn.Linear init (uniform +-1/sqrt(in_feats)); weights stored as [F_in, F_out]
    # (already transposed relative to PyTorch's [out, in]).
    bound = 1.0 / (F_IN ** 0.5)
    w_coff = jax.random.uniform(k_wc, (F_IN, F_OUT), minval=-bound, maxval=bound,
                                dtype=jnp.float32)
    b_coff = jax.random.uniform(k_bc, (F_OUT,), minval=-bound, maxval=bound,
                                dtype=jnp.float32)
    w_msg = jax.random.uniform(k_wm, (F_IN, F_OUT), minval=-bound, maxval=bound,
                               dtype=jnp.float32)
    b_msg = jax.random.uniform(k_bm, (F_OUT,), minval=-bound, maxval=bound,
                               dtype=jnp.float32)

    out = wavegin_forward(adj, feat, w_coff, b_coff, w_msg, b_msg, INIT_EPS,
                          tile_n=128, tile_k=128, compute_dtype=jnp.bfloat16)
    out = jax.block_until_ready(out)

    # Compare against a reference that uses the same bf16-input / f32-accumulate
    # numerics (the dtype downcast is an intentional perf tradeoff).
    ref = wavegin_ref(adj, feat, w_coff, b_coff, w_msg, b_msg, INIT_EPS,
                      compute_dtype=jnp.bfloat16)
    assert jnp.allclose(out, ref, atol=1e-2, rtol=1e-2), "mismatch vs reference"

    print("KERNEL_OK")
</pallas_src>

<mosaic_0001>
module attributes {stable_mosaic.version = 11 : i64} {
  func.func @wavegin_kernel(%arg0: i32, %arg1: i32, %arg2: memref<128x128xbf16, #tpu.memory_space<vmem>>, %arg3: memref<128x128xbf16, #tpu.memory_space<vmem>>, %arg4: memref<128x256xbf16, #tpu.memory_space<vmem>>, %arg5: memref<1x256xf32, #tpu.memory_space<vmem>>, %arg6: memref<128x128xf32, #tpu.memory_space<vmem>>, %arg7: memref<128x128xf32, #tpu.memory_space<vmem>>) attributes {dimension_semantics = [#tpu.dimension_semantics<parallel>, #tpu.dimension_semantics<arbitrary>], iteration_bounds = array<i64: 2, 2>, scalar_prefetch = 0 : i64, scratch_operands = 1 : i64, tpu.core_type = #tpu.core_type<tc>, window_params = [{transform_indices = @transform_0, window_bounds = array<i64: 128, 128>}, {transform_indices = @transform_1, window_bounds = array<i64: 128, 128>}, {pipeline_mode = #tpu.pipeline_mode<synchronous>, transform_indices = @transform_2, window_bounds = array<i64: 128, 256>}, {pipeline_mode = #tpu.pipeline_mode<synchronous>, transform_indices = @transform_3, window_bounds = array<i64: 1, 256>}, {transform_indices = @transform_4, window_bounds = array<i64: 128, 128>}]} {
    %c0_i32 = arith.constant 0 : i32
    %0 = arith.cmpi eq, %arg1, %c0_i32 : i32
    %1 = arith.extui %0 : i1 to i32
    %c0_i32_0 = arith.constant 0 : i32
    %2 = arith.cmpi ne, %1, %c0_i32_0 : i32
    scf.if %2 {
      %cst_9 = arith.constant 0.000000e+00 : f32
      %12 = vector.broadcast %cst_9 : f32 to vector<128x128xf32>
      %c0_10 = arith.constant 0 : index
      %c0_11 = arith.constant 0 : index
      %13 = vector.load %arg7[%c0_10, %c0_11] : memref<128x128xf32, #tpu.memory_space<vmem>>, vector<128x128xf32>
      tpu.vector_store %arg7[%c0_10, %c0_11], %12 {strides = array<i32>} : memref<128x128xf32, #tpu.memory_space<vmem>>, vector<128x128xf32>,
    } else {
    }
    %c0 = arith.constant 0 : index
    %c0_1 = arith.constant 0 : index
    %3 = vector.load %arg7[%c0, %c0_1] : memref<128x128xf32, #tpu.memory_space<vmem>>, vector<128x128xf32>
    %c0_2 = arith.constant 0 : index
    %c0_3 = arith.constant 0 : index
    %4 = vector.load %arg2[%c0_2, %c0_3] : memref<128x128xbf16, #tpu.memory_space<vmem>>, vector<128x128xbf16>
    %c0_4 = arith.constant 0 : index
    %c0_5 = arith.constant 0 : index
    %5 = vector.load %arg3[%c0_4, %c0_5] : memref<128x128xbf16, #tpu.memory_space<vmem>>, vector<128x128xbf16>
    %cst = arith.constant dense<0.000000e+00> : vector<128x128xf32>
    %6 = tpu.matmul %4, %5, %cst {dimension_numbers = #tpu.dot_dimension_numbers<[1], [0], [0], [1], [0, 0, 1, 1], [], []>} : vector<128x128xbf16>, vector<128x128xbf16>, vector<128x128xf32> -> vector<128x128xf32>
    %7 = arith.addf %3, %6 : vector<128x128xf32>
    %c0_6 = arith.constant 0 : index
    %c0_7 = arith.constant 0 : index
    %8 = vector.load %arg7[%c0_6, %c0_7] : memref<128x128xf32, #tpu.memory_space<vmem>>, vector<128x128xf32>
    tpu.vector_store %arg7[%c0_6, %c0_7], %7 {strides = array<i32>} : memref<128x128xf32, #tpu.memory_space<vmem>>, vector<128x128xf32>,
    %c1_i32 = arith.constant 1 : i32
    %9 = arith.cmpi eq, %arg1, %c1_i32 : i32
    %10 = arith.extui %9 : i1 to i32
    %c0_i32_8 = arith.constant 0 : i32
    %11 = arith.cmpi ne, %10, %c0_i32_8 : i32
    scf.if %11 {
      %c0_9 = arith.constant 0 : index
      %c0_10 = arith.constant 0 : index
      %12 = vector.load %arg7[%c0_9, %c0_10] : memref<128x128xf32, #tpu.memory_space<vmem>>, vector<128x128xf32>
      %13 = arith.truncf %12 : vector<128x128xf32> to vector<128x128xbf16>
      %c0_11 = arith.constant 0 : index
      %c0_12 = arith.constant 0 : index
      %14 = vector.load %arg4[%c0_11, %c0_12] : memref<128x256xbf16, #tpu.memory_space<vmem>>, vector<128x256xbf16>
      %cst_13 = arith.constant dense<0.000000e+00> : vector<128x256xf32>
      %15 = tpu.matmul %13, %14, %cst_13 {dimension_numbers = #tpu.dot_dimension_numbers<[1], [0], [0], [1], [0, 0, 1, 1], [], []>} : vector<128x128xbf16>, vector<128x256xbf16>, vector<128x256xf32> -> vector<128x256xf32>
      %c0_14 = arith.constant 0 : index
      %c0_15 = arith.constant 0 : index
      %16 = vector.load %arg5[%c0_14, %c0_15] : memref<1x256xf32, #tpu.memory_space<vmem>>, vector<1x256xf32>
      %17 = vector.broadcast %16 : vector<1x256xf32> to vector<128x256xf32>
      %18 = arith.addf %15, %17 : vector<128x256xf32>
      %19 = vector.extract_strided_slice %18 {offsets = [0, 0], sizes = [128, 128], strides = [1, 1]} : vector<128x256xf32> to vector<128x128xf32>
      %20 = arith.negf %19 : vector<128x128xf32>
      %21 = math.exp %20 : vector<128x128xf32>
      %cst_16 = arith.constant 1.000000e+00 : f32
      %22 = vector.broadcast %cst_16 : f32 to vector<128x128xf32>
      %23 = arith.addf %22, %21 : vector<128x128xf32>
      %24 = arith.divf %22, %23 : vector<128x128xf32>
      %25 = vector.extract_strided_slice %18 {offsets = [0, 128], sizes = [128, 128], strides = [1, 1]} : vector<128x256xf32> to vector<128x128xf32>
      %26 = math.tanh %25 : vector<128x128xf32>
      %27 = arith.mulf %24, %26 : vector<128x128xf32>
      %c0_17 = arith.constant 0 : index
      %c0_18 = arith.constant 0 : index
      %28 = vector.load %arg6[%c0_17, %c0_18] : memref<128x128xf32, #tpu.memory_space<vmem>>, vector<128x128xf32>
      tpu.vector_store %arg6[%c0_17, %c0_18], %27 {strides = array<i32>} : memref<128x128xf32, #tpu.memory_space<vmem>>, vector<128x128xf32>,
    } else {
    }
    return
  }
  func.func @transform_0(%arg0: i32, %arg1: i32) -> (i32, i32) {
    %c0_i32 = arith.constant 0 : i32
    return %arg0, %arg1 : i32, i32
  }
  func.func @transform_1(%arg0: i32, %arg1: i32) -> (i32, i32) {
    %c0_i32 = arith.constant 0 : i32
    %c0_i32_0 = arith.constant 0 : i32
    return %arg1, %c0_i32 : i32, i32
  }
  func.func @transform_2(%arg0: i32, %arg1: i32) -> (i32, i32) {
    %c0_i32 = arith.constant 0 : i32
    %c0_i32_0 = arith.constant 0 : i32
    %c0_i32_1 = arith.constant 0 : i32
    return %c0_i32, %c0_i32_0 : i32, i32
  }
  func.func @transform_3(%arg0: i32, %arg1: i32) -> (i32, i32) {
    %c0_i32 = arith.constant 0 : i32
    %c0_i32_0 = arith.constant 0 : i32
    %c0_i32_1 = arith.constant 0 : i32
    return %c0_i32, %c0_i32_0 : i32, i32
  }
  func.func @transform_4(%arg0: i32, %arg1: i32) -> (i32, i32) {
    %c0_i32 = arith.constant 0 : i32
    %c0_i32_0 = arith.constant 0 : i32
    return %arg0, %c0_i32 : i32, i32
  }
}

</mosaic_0001>

<bundles_post_ra>
// kernel: tpu_custom_call.1
= control target key start
LH: loop header
LB: loop body
LE: loop exit
PB: predicated region body
PF: predicated region fallthrough
CT: control target
= control target key end

     0   :  { %s2316_s0 = inlined_call_operand.hbm [shape: bf16[256,256], index: 0, kind: input, shape index: {}]   ;;  %s2317_s1 = inlined_call_operand.hbm [shape: bf16[256,128], index: 1, kind: input, shape index: {}]   ;;  %s2318_s2 = inlined_call_operand.hbm [shape: bf16[128,256], index: 2, kind: input, shape index: {}]   ;;  %s2319_s3 = inlined_call_operand.vmem [shape: f32[1,256], index: 3, kind: input, shape index: {}]   ;;  %s2320_s4 = inlined_call_operand.hbm [shape: f32[256,128], index: 4, kind: output, shape index: {}]  }
   0x1   :  { %2341 = sst [smem:[#allocation23_spill]] %s2316_s0 }
   0x2   :  { %2342 = sst [smem:[#allocation24_spill]] %s2318_s2 }
   0x3   :  { %2343 = sst [smem:[#allocation25_spill]] %s2319_s3 }
   0x4   :  { %2344 = sst [smem:[#allocation26_spill]] %s2320_s4 }
   0x5   :  { %9 = vsyncpa [#allocation4], 0 }
   0x6   :  { %11 = vsyncpa [#allocation4 + $0x1], 0 }
   0x7   :  { %12 = vsyncpa [#allocation7], 0 }
   0x8   :  { %14 = vsyncpa [#allocation7 + $0x1], 0 }
   0x9   :  { %15 = vsyncpa [#allocation5], 0 }
   0xa   :  { %17 = vsyncpa [#allocation5 + $0x1], 0  ;;  %s1830_s15 = smov 0   ;;  %s1832_s16 = smov 0  }
   0xb   :  { %s1834_s17 = smov 0   ;;  %s1836_s18 = smov 0  }
   0xc   :  { %s1838_s19 = smov 0   ;;  %s1840_s20 = smov 0  }
   0xd   :  { %s1842_s21 = smov 0   ;;  %s1844_s22 = smov 0  }
   0xe   :  { %s1846_s23 = smov 0   ;;  %s1848_s24 = smov 0  }
   0xf   :  { %s1850_s25 = smov 0   ;;  %s1852_s26 = smov 0  }
  0x10   :  { %s1854_s27 = smov 0   ;;  %s1856_s28 = smov 0  }
  0x11 LB: > { %2345 = sst [smem:[#allocation14_spill]] %s1739_s15  ;;  %s1897_s29 = sadd.s32 4294967295, %s1791_s28   ;;  %s1791_s28 = sphi %s1856_s28, %s23_s28   ;;  %s1787_s27 = sphi %s1854_s27, %s2404_s27   ;;  %s1783_s26 = sphi %s1852_s26, %s2403_s26   ;;  %s1779_s25 = sphi %s1850_s25, %s2402_s25   ;;  %s1775_s24 = sphi %s1848_s24, %s2401_s24   ;;  %s1771_s23 = sphi %s1846_s23, %s2400_s23   ;;  %s1767_s22 = sphi %s1844_s22, %s2399_s22   ;;  %s1763_s21 = sphi %s1842_s21, %s2398_s21   ;;  %s1759_s20 = sphi %s1840_s20, %s2397_s20   ;;  %s1755_s19 = sphi %s1838_s19, %s2396_s19   ;;  %s1751_s18 = sphi %s1836_s18, %s2395_s18   ;;  %s1747_s17 = sphi %s1834_s17, %s2394_s17   ;;  %s1743_s16 = sphi %s1832_s16, %s2393_s16   ;;  %s1739_s15 = sphi %s1830_s15, %s2389_s15  }
  0x12   : > { %2346 = sst [smem:[#allocation15_spill]] %s1743_s16  ;;  %s1109_s30 = sadd.s32 4294967294, %s1791_s28  }
  0x13   : > { %2347 = sst [smem:[#allocation16_spill]] %s1775_s24  ;;  %p57_p0 = scmp.ne.s32.totalorder %s1767_s22, %s1763_s21 }
  0x14   : > { %2348 = sst [smem:[#allocation17_spill]] %s1779_s25  ;;  %p2323_p1 = scmp.eq.s32.totalorder %s1897_s29, 0 }
  0x15   : > { %2349 = sst [smem:[#allocation18_spill]] %s1897_s29  ;;  %p83_p2 = scmp.ne.s32.totalorder %s1755_s19, %s1751_s18 }
  0x16   : > { %p1906_p3 = por %p2323_p1, %p57_p0  ;;  %p148_p4 = scmp.ne.s32.totalorder %s1747_s17, %s1743_s16 }
  0x17   : > { %p1914_p5 = por %p83_p2, %p2323_p1  ;;  %p149_p6 = scmp.eq.s32.totalorder %s1897_s29, 3 }
  0x18   : > { %s2350_s6 = scalar_select %p1906_p3, 1, 0 }
  0x19   : > { %s2351_s7 = scalar_select %p1914_p5, 1, 0 }
  0x1a   : > { %p154_p7 = scmp.ne.s32.totalorder %s1743_s16, %s1739_s15  ;;  %p155_p8 = scmp.eq.s32.totalorder %s1109_s30, 3 }
  0x1b   : > { %2352 = sst [smem:[#allocation19_spill]] %s2351_s7  ;;  %p1921_p9 = por %p149_p6, %p148_p4 }
  0x1c   : > { %p1110_p10 = scmp.ge.s32.totalorder %s1791_s28, 1  ;;  %p1926_p11 = por %p155_p8, %p154_p7 }
  0x1d   : > { %s2353_s8 = scalar_select %p1921_p9, 1, 0 }
  0x1e   : > { %s2355_s9 = scalar_select %p1926_p11, 1, 0 }
  0x1f   : > { %2354 = sst [smem:[#allocation20_spill]] %s2353_s8  ;;  %p162_p12 = scmp.lt.s32.totalorder %s1791_s28, 5 }
  0x20   : > { %2356 = sst [smem:[#allocation21_spill]] %s2355_s9  ;;  %s1793_s11 = smov [#allocation8]  }
  0x21   : > { %p1931_p13 = pnand %p1110_p10, %p162_p12  ;;  %s174_s12 = sshll.u32 %s1793_s11, 4  ;;  %s175_s12 = int_to_ptr.vmem [resolvable:$true] %s174_s12 }
  0x22   : > { %s2359_s2 = sld [smem:[#allocation24_spill]] }
  0x23   : > { %s2357_s10 = scalar_select %p1931_p13, 1, 0 }
  0x24   : > { %p1273_p0 = pneg %p1931_p13 }
  0x26   : > { %p1939_p2 = pnand %p1273_p0, %p2323_p1 }
  0x28   : > { %s1549_s21 = scalar_lea.hbm %s2359_s2, 2048  ;;  %p1551_p6 = pneg %p1939_p2 }
  0x29   : > { %p1550_p4 = scmp.ne.s32.totalorder %s2359_s2, %s1549_s21  ;;  %p1556_p10 = scmp.lt.u32.totalorder %s1549_s21, %s2359_s2 }
  0x2b   : > { %p1552_p7 = pnand %p1551_p6, %p1550_p4 }
  0x2d   : > { %p1553_p8 = pneg %p1552_p7 }
  0x2f   : > { %p1558_p12 = pnand %p1556_p10, %p1553_p8 }
  0x31   : > { %1561 = shalt.err (!%p1558_p12)
}
  0x32   : > { %s1562_s15 = scalar_lea.vmem %s175_s12, 2048  ;;  %p1570_p9 = scmp.lt.s32.totalorder %s175_s12, %s175_s12 }
  0x33   : > { %p1563_p0 = scmp.ne.s32.totalorder %s175_s12, %s1562_s15  ;;  %p1571_p5 = scmp.lt.s32.totalorder %s1562_s15, %s1562_s15 }
  0x35   : > { %p1565_p1 = pnand %p1563_p0, %p1551_p6  ;;  %p1572_p3 = por %p1571_p5, %p1570_p9 }
  0x37   : > { %p1566_p11 = pneg %p1565_p1 }
  0x39   : > { %p1573_p13 = pnand %p1572_p3, %p1566_p11 }
  0x3b   : > { %1576 = shalt.err (!%p1573_p13)
}
  0x3c   : > { %s2328_s5 = smov 128   ;;  %s1795_s9 = smov 8  }
  0x3d   : > { %1276 = dma.hbm_to_vmem [thread:$0]  (!%p1939_p2), %s2359_s2, 2048, %s175_s12, [#allocation7], %s2328_s5, %s2328_s5, %s1795_s9  }
  0x3e   : > { %s32_s18 = sadd.s32 1, %s1783_s26  ;;  %s35_s21 = sadd.s32 1, %s1787_s27 }
  0x3f   : > { %p33_p1 = scmp.ge.s32.totalorder %s32_s18, 2  ;;  %s44_s30 = sadd.s32 1, %s1771_s23 }
  0x40   : > { %p51_p3 = scmp.ne.s32.totalorder %s1771_s23, %s1767_s22  ;;  %p2340_p5 = scmp.eq.s32.totalorder %s1791_s28, 0 }
  0x41   : > { %s2406_s18 = smov (%p33_p1, %s32_s18), 0  ;;  %s2408_s21 = smov (!%p33_p1, %s35_s21), %s1787_s27 }
  0x42   : > { %2360 = sst [smem:[#allocation22_spill]] %s2406_s18  ;;  %s1971_s13 = ssub.s32 %s1783_s26, %s2406_s18 }
  0x43   : > { %p37_p9 = scmp.ge.s32.totalorder %s2408_s21, 2  ;;  %p68_p11 = scmp.eq.s32.totalorder %s1971_s13, 0 }
  0x44   : > { %p1977_p13 = por %p2340_p5, %p51_p3  ;;  %p2339_p2 = scmp.lt.s32.totalorder %s1791_s28, 4 }
  0x45   : > { %s2410_s21 = smov (%p37_p9, %s2408_s21), 0  ;;  %s191_s11 = sand.u32 1, %s1771_s23  }
  0x46   : > { %s1180_s9 = sshll.u32 %s1787_s27, 5  ;;  %s39_s15 = ssub.s32 %s1787_s27, %s2410_s21 }
  0x47   : > { %s41_s14 = sor.u32 %s1971_s13, %s39_s15  ;;  %p136_p4 = scmp.eq.s32.totalorder %s39_s15, 0 }
  0x48   : > { %p42_p6 = scmp.eq.s32.totalorder %s41_s14, 0  ;;  %s1113_s5 = sshll.u32 %s191_s11, 6 }
  0x49   : > { %s2362_s2 = sadd.s32 1, %s1747_s17  ;;  %s201_s8 = sadd.s32 %s1783_s26, %s1180_s9 }
  0x4a   : > { %s1992_s18 = scalar_select %p136_p4, %s1747_s17, %s2362_s2  }
  0x4b   : > { %s1995_s4 = scalar_select %p42_p6, %s1771_s23, %s44_s30  }
  0x4c   : > { %s1116_s25 = sshll.u32 %s201_s8, 6  ;;  %s195_s3 = scalar_lea.vmem [#allocation3], %s1113_s5 }
  0x4d   : > { %s204_s24 = sshll.u32 %s195_s3, 4  ;;  %s2363_s0 = sld [smem:[#allocation23_spill]]  ;;  %s2003_s24 = int_to_ptr.vmem [resolvable:$true] %s204_s24 }
  0x4e   : > { %p2009_p7 = pnand %p2339_p2, %p1977_p13  ;;  %s2013_s3 = scalar_lea.sflag [#allocation4], %s191_s11 }
  0x50   : > { %p1579_p10 = pneg %p2009_p7 }
  0x53   : > { %s2001_s29 = scalar_lea.hbm %s2363_s0, %s1116_s25  ;;  %s1582_s7 = scalar_lea.hbm %s2363_s0, 4096 }
  0x54   : > { %s1577_s8 = scalar_lea.hbm %s2001_s29, 1024  ;;  %p1583_p1 = scmp.lt.u32.totalorder %s2001_s29, %s2363_s0 }
  0x55   : > { %p1578_p8 = scmp.ne.s32.totalorder %s2001_s29, %s1577_s8  ;;  %p1584_p3 = scmp.lt.u32.totalorder %s1582_s7, %s1577_s8 }
  0x56   : > { %p1586_p13 = scmp.lt.u32.totalorder %s1577_s8, %s2001_s29 }
  0x57   : > { %p1580_p12 = pnand %p1579_p10, %p1578_p8  ;;  %p1585_p9 = por %p1584_p3, %p1583_p1 }
  0x59   : > { %p1581_p0 = pneg %p1580_p12  ;;  %p1587_p4 = por %p1586_p13, %p1585_p9 }
  0x5b   : > { %p1588_p6 = pnand %p1587_p4, %p1581_p0 }
  0x5d   : > { %1591 = shalt.err (!%p1588_p6)
}
  0x5e   : > { %s1592_s12 = scalar_lea.vmem %s2003_s24, 1024  ;;  %s1796_s11 = smov [#allocation3]  }
  0x5f   : > { %p1593_p8 = scmp.ne.s32.totalorder %s2003_s24, %s1592_s12  ;;  %s1597_s9 = sshll.u32 %s1796_s11, 4  ;;  %s1598_s9 = int_to_ptr.vmem [resolvable:$false] %s1597_s9 }
  0x60   : > { %s1599_s15 = scalar_lea.vmem %s1598_s9, 2048  ;;  %p1600_p5 = scmp.lt.s32.totalorder %s2003_s24, %s1598_s9 }
  0x61   : > { %p1595_p12 = pnand %p1593_p8, %p1579_p10  ;;  %p1601_p1 = scmp.lt.s32.totalorder %s1599_s15, %s1592_s12 }
  0x63   : > { %p1596_p2 = pneg %p1595_p12  ;;  %p1602_p3 = por %p1601_p1, %p1600_p5 }
  0x65   : > { %p1603_p9 = pnand %p1602_p3, %p1596_p2 }
  0x67   : > { %1606 = shalt.err (!%p1603_p9)
}
  0x68   : > { %s1797_s14 = smov 64   ;;  %s1798_s8 = smov 4  }
  0x69   : > { %s2365_s16 = smov 128   ;;  %s70_s25 = sadd.s32 1, %s1759_s20 }
  0x6a   : > { %1280 = dma.hbm_to_vmem [thread:$0]  (!%p2009_p7), %s2001_s29, 1024, %s2003_s24, %s2013_s3, %s2365_s16, %s1797_s14, %s1798_s8  }
  0x6b   : > { %p77_p5 = scmp.ne.s32.totalorder %s1759_s20, %s1755_s19  ;;  %p2366_p2 = scmp.eq.s32.totalorder %s1791_s28, 0 }
  0x6c   : > { %s2050_s7 = scalar_select %p68_p11, %s1759_s20, %s70_s25  }
  0x6d   : > { %p79_p10 = por %p77_p5, %p2366_p2  ;;  %s214_s5 = sand.u32 1, %s1791_s28  }
  0x6e   : > { %s216_s30 = sand.u32 1, %s1759_s20   ;;  %s1181_s11 = sshll.u32 %s1783_s26, 10 }
  0x6f   : > { %s1117_s12 = sshll.u32 %s216_s30, 6  ;;  %s2060_s0 = scalar_lea.hbm %s2317_s1, %s1181_s11 }
  0x70   : > { %s218_s24 = scalar_lea.vmem [#allocation6], %s1117_s12  ;;  %p2367_p7 = scmp.lt.s32.totalorder %s1791_s28, 4 }
  0x71   : > { %s225_s29 = sshll.u32 %s218_s24, 4  ;;  %s2070_s2 = scalar_lea.sflag [#allocation7], %s214_s5  ;;  %s2068_s29 = int_to_ptr.vmem [resolvable:$true] %s225_s29 }
  0x72   : > { %p2064_p11 = pnand %p2367_p7, %p79_p10  ;;  %s1607_s3 = scalar_lea.hbm %s2060_s0, 1024 }
  0x73   : > { %p1608_p0 = scmp.ne.s32.totalorder %s2060_s0, %s1607_s3  ;;  %s1612_s30 = scalar_lea.hbm %s2317_s1, 2048 }
  0x74   : > { %p1609_p13 = pneg %p2064_p11  ;;  %p1613_p8 = scmp.lt.u32.totalorder %s2060_s0, %s2317_s1 }
  0x75   : > { %p1614_p12 = scmp.lt.u32.totalorder %s1612_s30, %s1607_s3  ;;  %p1616_p3 = scmp.lt.u32.totalorder %s1607_s3, %s2060_s0 }
  0x76   : > { %p1610_p4 = pnand %p1609_p13, %p1608_p0 }
  0x77   : > { %p1615_p1 = por %p1614_p12, %p1613_p8 }
  0x78   : > { %p1611_p6 = pneg %p1610_p4 }
  0x79   : > { %p1617_p9 = por %p1616_p3, %p1615_p1 }
  0x7b   : > { %p1618_p5 = pnand %p1617_p9, %p1611_p6 }
  0x7d   : > { %1621 = shalt.err (!%p1618_p5)
}
  0x7e   : > { %s1622_s5 = scalar_lea.vmem %s2068_s29, 1024  ;;  %s1799_s9 = smov [#allocation6]  }
  0x7f   : > { %p1623_p2 = scmp.ne.s32.totalorder %s2068_s29, %s1622_s5  ;;  %s1627_s15 = sshll.u32 %s1799_s9, 4  ;;  %s1628_s15 = int_to_ptr.vmem [resolvable:$false] %s1627_s15 }
  0x80   : > { %s1629_s24 = scalar_lea.vmem %s1628_s15, 2048  ;;  %p1630_p0 = scmp.lt.s32.totalorder %s2068_s29, %s1628_s15 }
  0x81   : > { %p1625_p10 = pnand %p1623_p2, %p1609_p13  ;;  %p1631_p4 = scmp.lt.s32.totalorder %s1629_s24, %s1622_s5 }
  0x83   : > { %p1626_p7 = pneg %p1625_p10  ;;  %p1632_p8 = por %p1631_p4, %p1630_p0 }
  0x85   : > { %p1633_p12 = pnand %p1632_p8, %p1626_p7 }
  0x87   : > { %1636 = shalt.err (!%p1633_p12)
}
  0x88   : > { %1283 = dma.hbm_to_vmem [thread:$0]  (!%p2064_p11), %s2060_s0, 1024, %s2068_s29, %s2070_s2, %s1797_s14, %s1797_s14, %s1798_s8  }
  0x89   : > { %p2369_p13 = scmp.ne.s32.totalorder %s2357_s10, 0 }
  0x8a   : > { %s239_s3 = sand.u32 (!%p2369_p13), 1, %s1767_s22   ;;  %p2370_p6 = scmp.ne.s32.totalorder (!%p2369_p13), %s2350_s6, 0 }
  0x8b   : > { %237 = sbr.rel (%p2369_p13) target bundleno = 745 (0x2e9), region = 36  ;;  %s1121_s16 = sshll.u32 (!%p2369_p13), %s239_s3, 6 }
  0x8c   : > { %s240_s25 = scalar_lea.sflag (!%p2369_p13), [#allocation4], %s239_s3  ;;  %s2104_s30 = scalar_lea.vmem (!%p2369_p13), [#allocation3], %s1121_s16 }
  0x92   : > { %1722 = dma.done.wait (%p2370_p6), %s240_s25, 1024  }
  0x93   : > { %1724 = vsyncadd (%p2370_p6), %s240_s25, 4294966272  ;;  %s2371_s13 = sld [smem:[#allocation18_spill]]  ;;  %s2372_s12 = sld [smem:[#allocation19_spill]] }
  0x94   : > { %s250_s0 = sand.u32 1, %s1755_s19  }
  0x95   : > { %s1122_s14 = sshll.u32 %s250_s0, 6 }
  0x96   : > { %s2112_s8 = scalar_lea.vmem [#allocation6], %s1122_s14 }
  0x99   : > { %s248_s11 = sand.u32 1, %s2371_s13   ;;  %p2373_p11 = scmp.ne.s32.totalorder %s2372_s12, 0 }
  0x9a   : > { %s249_s10 = scalar_lea.sflag [#allocation7], %s248_s11 }
  0x9b   : > { %1726 = dma.done.wait (%p2373_p11), %s249_s10, 1024  }
  0x9c   : > { %1728 = vsyncadd (%p2373_p11), %s249_s10, 4294966272  ;;  %p2374_p1 = scmp.eq.s32.totalorder %s2371_s13, 0 }
  0x9e   : > { %1730 = dma.done.wait (%p2374_p1), [#allocation7], 2048   ;;  %p2375_p3 = pmov %p2374_p1 }
  0x9f   : > { %s2376_s6 = sld [smem:[#allocation15_spill]]  ;;  %s2377_s9 = sld [smem:[#allocation16_spill]] }
  0xa0   : > { %1732 = vsyncadd (%p2375_p3), [#allocation7], 4294965248 }
  0xa5   : > { %s283_s29 = sand.u32 1, %s2376_s6   ;;  %p1125_p9 = scmp.ne.s32.totalorder %s2377_s9, 0 }
  0xa6   : > { %s1124_s2 = sshll.u32 %s283_s29, 7  ;;  %v1800_v0 = vmov (!%p1125_p9), 0.0  }
  0xa7   : > { %s2125_s5 = scalar_lea.vmem [#allocation9], %s1124_s2  ;;  %293 = sbr.rel (%p1125_p9) target bundleno = 175 (0xaf), region = 52  ;;  %294 = vst [vmem:[#allocation2] sm:$0xff] (!%p1125_p9), %v1800_v0  ;;  %295 = vst [vmem:[#allocation2 + $0x8] sm:$0xff] (!%p1125_p9), %v1800_v0 }
  0xa8   : > { %296 = vst [vmem:[#allocation2 + $0x10] sm:$0xff] (!%p1125_p9), %v1800_v0  ;;  %297 = vst [vmem:[#allocation2 + $0x18] sm:$0xff] (!%p1125_p9), %v1800_v0 }
  0xa9   : > { %298 = vst [vmem:[#allocation2 + $0x20] sm:$0xff] (!%p1125_p9), %v1800_v0  ;;  %299 = vst [vmem:[#allocation2 + $0x28] sm:$0xff] (!%p1125_p9), %v1800_v0 }
  0xaa   : > { %300 = vst [vmem:[#allocation2 + $0x30] sm:$0xff] (!%p1125_p9), %v1800_v0  ;;  %301 = vst [vmem:[#allocation2 + $0x38] sm:$0xff] (!%p1125_p9), %v1800_v0 }
  0xab   : > { %302 = vst [vmem:[#allocation2 + $0x40] sm:$0xff] (!%p1125_p9), %v1800_v0  ;;  %303 = vst [vmem:[#allocation2 + $0x48] sm:$0xff] (!%p1125_p9), %v1800_v0 }
  0xac   : > { %304 = vst [vmem:[#allocation2 + $0x50] sm:$0xff] (!%p1125_p9), %v1800_v0  ;;  %305 = vst [vmem:[#allocation2 + $0x58] sm:$0xff] (!%p1125_p9), %v1800_v0 }
  0xad   : > { %306 = vst [vmem:[#allocation2 + $0x60] sm:$0xff] (!%p1125_p9), %v1800_v0  ;;  %307 = vst [vmem:[#allocation2 + $0x68] sm:$0xff] (!%p1125_p9), %v1800_v0 }
  0xae   : > { %308 = vst [vmem:[#allocation2 + $0x70] sm:$0xff] %v1800_v0  ;;  %309 = vst [vmem:[#allocation2 + $0x78] sm:$0xff] %v1800_v0 }
  0xaf PF: > { %v1413_v1 = vld [vmem:[%s2112_s8] sm:$0xff]   ;;  %v1414_v2 = vld [vmem:[%s2112_s8 + $0x8] sm:$0xff]   ;;  %v1415_v3 = vld [vmem:[%s2112_s8 + $0x10] sm:$0xff]   ;;  %s2378_s15 = sld [smem:[#allocation16_spill]] }
  0xb0   : > { %1199 = vmatprep.subr.bf16.mxu0 %v1413_v1  ;;  %1231 = vmatprep.subr.bf16.mxu1 %v1413_v1  ;;  %v1416_v4 = vld [vmem:[%s2112_s8 + $0x18] sm:$0xff]   ;;  %v1421_v5 = vld [vmem:[%s2104_s30] sm:$0xff]   ;;  %v1418_v8 = vld [vmem:[%s2112_s8 + $0x28] sm:$0xff]  }
  0xb1   : > { %1200 = vmatpush3.bf16.msra.mxu0 %v1413_v1  ;;  %1239 = vmatpush3.bf16.msra.mxu1 %v1413_v1  ;;  %v1422_v6 = vld [vmem:[%s2104_s30 + $0x20] sm:$0xff]   ;;  %v1419_v9 = vld [vmem:[%s2112_s8 + $0x30] sm:$0xff]   ;;  %v1420_v10 = vld [vmem:[%s2112_s8 + $0x38] sm:$0xff]  }
  0xb2   : > { %1201 = vmatprep.subr.bf16.mxu0 %v1414_v2  ;;  %1232 = vmatprep.subr.bf16.mxu1 %v1414_v2  ;;  %v1417_v7 = vld [vmem:[%s2112_s8 + $0x20] sm:$0xff]   ;;  %v1423_v11 = vld [vmem:[%s2104_s30 + $0x8] sm:$0xff]   ;;  %v1425_v13 = vld [vmem:[%s2104_s30 + $0x10] sm:$0xff]  }
  0xb3   : > { %1215 = vmatprep.mubr.bf16.mxu0 %v1421_v5  ;;  %1223 = vmatprep.mubr.bf16.mxu1 %v1422_v6  ;;  %v1424_v12 = vld [vmem:[%s2104_s30 + $0x28] sm:$0xff]   ;;  %v1426_v14 = vld [vmem:[%s2104_s30 + $0x30] sm:$0xff]   ;;  %v1427_v15 = vld [vmem:[%s2104_s30 + $0x18] sm:$0xff]  }
  0xb4   : > { %v1428_v16 = vld [vmem:[%s2104_s30 + $0x38] sm:$0xff]   ;;  %v312_v17 = vld [vmem:[#allocation2 + $0x10] sm:$0xff]  ;;  %v310_v19 = vld [vmem:[#allocation2] sm:$0xff] }
  0xb5   : > { %1202 = vmatpush3.bf16.msra.mxu0 %v1414_v2  ;;  %1240 = vmatpush3.bf16.msra.mxu1 %v1414_v2  ;;  %v320_v18 = vld [vmem:[#allocation2 + $0x50] sm:$0xff]  ;;  %v318_v20 = vld [vmem:[#allocation2 + $0x40] sm:$0xff]  ;;  %v313_v23 = vld [vmem:[#allocation2 + $0x18] sm:$0xff]  ;;  %p1142_p5 = scmp.ne.s32.totalorder %s2378_s15, 1 }
  0xb6   : > { %1203 = vmatprep.subr.bf16.mxu0 %v1415_v3  ;;  %1233 = vmatprep.subr.bf16.mxu1 %v1415_v3  ;;  %v321_v24 = vld [vmem:[#allocation2 + $0x58] sm:$0xff]  ;;  %v311_v29 = vld [vmem:[#allocation2 + $0x8] sm:$0xff]  ;;  %v316_v41 = vld [vmem:[#allocation2 + $0x30] sm:$0xff]  ;;  %s2379_s16 = sld [smem:[#allocation25_spill]] (!%p1142_p5) }
  0xb7   : > { %v319_v30 = vld [vmem:[#allocation2 + $0x48] sm:$0xff]  ;;  %v324_v42 = vld [vmem:[#allocation2 + $0x70] sm:$0xff]  ;;  %v314_v43 = vld [vmem:[#allocation2 + $0x20] sm:$0xff] }
  0xb8   : > { %v322_v44 = vld [vmem:[#allocation2 + $0x60] sm:$0xff]  ;;  %v317_v47 = vld [vmem:[#allocation2 + $0x38] sm:$0xff]  ;;  %v315_v53 = vld [vmem:[#allocation2 + $0x28] sm:$0xff] }
  0xb9   : > { %1204 = vmatpush3.bf16.msra.mxu0 %v1415_v3  ;;  %1241 = vmatpush3.bf16.msra.mxu1 %v1415_v3  ;;  %v325_v48 = vld [vmem:[#allocation2 + $0x78] sm:$0xff]  ;;  %v323_v54 = vld [vmem:[#allocation2 + $0x68] sm:$0xff]  ;;  %v1801_v3 = vmov (!%p1142_p5), 0  }
  0xba   : > { %1205 = vmatprep.subr.bf16.mxu0 %v1416_v4  ;;  %1234 = vmatprep.subr.bf16.mxu1 %v1416_v4  ;;  %v1429_v1 = vld [vmem:[#allocation8 + $0x4] ss:$8 sps:$4 sm:$0xff] (!%p1142_p5)   ;;  %v1431_v2 = vld [vmem:[#allocation8] ss:$8 sps:$4 sm:$0xff] (!%p1142_p5)   ;;  %v1434_v5 = vld [vmem:[#allocation8 + $0x10] ss:$8 sps:$4 sm:$0xff] (!%p1142_p5)  }
  0xbb   : > { %v1435_v6 = vld [vmem:[#allocation8 + $0x24] ss:$8 sps:$4 sm:$0xff] (!%p1142_p5)  }
  0xbd   : > { %1206 = vmatpush3.bf16.msra.mxu0 %v1416_v4  ;;  %1242 = vmatpush3.bf16.msra.mxu1 %v1416_v4  ;;  %v1432_v4 = vld [vmem:[#allocation8 + $0x14] ss:$8 sps:$4 sm:$0xff] (!%p1142_p5)  }
  0xbe   : > { %1207 = vmatprep.subr.bf16.mxu0 %v1417_v7  ;;  %1235 = vmatprep.subr.bf16.mxu1 %v1417_v7 }
  0xc1   : > { %1208 = vmatpush3.bf16.msra.mxu0 %v1417_v7  ;;  %1243 = vmatpush3.bf16.msra.mxu1 %v1417_v7  ;;  %v1437_v7 = vld [vmem:[#allocation8 + $0x20] ss:$8 sps:$4 sm:$0xff] (!%p1142_p5)  }
  0xc2   : > { %1209 = vmatprep.subr.bf16.mxu0 %v1418_v8  ;;  %1236 = vmatprep.subr.bf16.mxu1 %v1418_v8 }
  0xc5   : > { %1210 = vmatpush3.bf16.msra.mxu0 %v1418_v8  ;;  %1244 = vmatpush3.bf16.msra.mxu1 %v1418_v8  ;;  %v1438_v8 = vld [vmem:[#allocation8 + $0x34] ss:$8 sps:$4 sm:$0xff] (!%p1142_p5)  }
  0xc6   : > { %1211 = vmatprep.subr.bf16.mxu0 %v1419_v9  ;;  %1237 = vmatprep.subr.bf16.mxu1 %v1419_v9 }
  0xc9   : > { %1212 = vmatpush3.bf16.msra.mxu0 %v1419_v9  ;;  %1245 = vmatpush3.bf16.msra.mxu1 %v1419_v9  ;;  %v1440_v9 = vld [vmem:[#allocation8 + $0x30] ss:$8 sps:$4 sm:$0xff] (!%p1142_p5)  }
  0xca   : > { %1213 = vmatprep.subr.bf16.mxu0 %v1420_v10  ;;  %1238 = vmatprep.subr.bf16.mxu1 %v1420_v10 }
  0xcd   : > { %1214 = vmatpush3.bf16.msra.mxu0 %v1420_v10  ;;  %1246 = vmatpush3.bf16.msra.mxu1 %v1420_v10  ;;  %v1441_v10 = vld [vmem:[#allocation8 + $0x44] ss:$8 sps:$4 sm:$0xff] (!%p1142_p5)  }
  0xce   : > { %719 = vmatprep.subr.bf16.mxu0 (!%p1142_p5), %v1429_v1  ;;  %1247 = vmatprep.subr.bf16.mxu1 (!%p1142_p5), %v1429_v1 }
  0xd0   : > { %1216 = vmatmul.mubr.bf16.vlgmr.msra.gmra.mrb[0].mxu0 %v1423_v11  ;;  %1224 = vmatmul.mubr.bf16.vlgmr.msra.gmra.mrb[0].mxu1 %v1424_v12  ;;  %v1443_v11 = vld [vmem:[#allocation8 + $0x40] ss:$8 sps:$4 sm:$0xff] (!%p1142_p5)   ;;  %v1444_v12 = vld [vmem:[#allocation8 + $0x54] ss:$8 sps:$4 sm:$0xff] (!%p1142_p5)  }
  0xd1   : > { %1219 = vmatprep.mubr.bf16.mxu0 %v1425_v13  ;;  %1227 = vmatprep.mubr.bf16.mxu1 %v1426_v14  ;;  %v1446_v13 = vld [vmem:[#allocation8 + $0x50] ss:$8 sps:$4 sm:$0xff] (!%p1142_p5)   ;;  %v1447_v14 = vld [vmem:[#allocation8 + $0x64] ss:$8 sps:$4 sm:$0xff] (!%p1142_p5)  }
  0xd2   : > { %720 = vmatpush1.bf16.msra.mxu0 (!%p1142_p5), %v1431_v2  ;;  %1255 = vmatpush1.bf16.msra.mxu1 (!%p1142_p5), %v1431_v2 }
  0xd3   : > { %721 = vmatprep.subr.bf16.mxu0 (!%p1142_p5), %v1432_v4  ;;  %1248 = vmatprep.subr.bf16.mxu1 (!%p1142_p5), %v1432_v4 }
  0xd6   : > { %722 = vmatpush1.bf16.msra.mxu0 (!%p1142_p5), %v1434_v5  ;;  %1256 = vmatpush1.bf16.msra.mxu1 (!%p1142_p5), %v1434_v5 }
  0xd7   : > { %723 = vmatprep.subr.bf16.mxu0 (!%p1142_p5), %v1435_v6  ;;  %1249 = vmatprep.subr.bf16.mxu1 (!%p1142_p5), %v1435_v6 }
  0xd8   : > { %1220 = vmatmul.mubr.bf16.gmra.mrb[4].mxu0 %v1427_v15  ;;  %1228 = vmatmul.mubr.bf16.gmra.mrb[4].mxu1 %v1428_v16  ;;  %v1449_v15 = vld [vmem:[#allocation8 + $0x60] ss:$8 sps:$4 sm:$0xff] (!%p1142_p5)   ;;  %v1450_v16 = vld [vmem:[#allocation8 + $0x74] ss:$8 sps:$4 sm:$0xff] (!%p1142_p5)  }
  0xd9   : > { %751 = vmatprep.mubr.bf16.mxu0 (!%p1142_p5), %v1801_v3  ;;  %791 = vmatprep.mubr.bf16.mxu1 (!%p1142_p5), %v1801_v3 }
  0xda   : > { %724 = vmatpush1.bf16.msra.mxu0 (!%p1142_p5), %v1437_v7  ;;  %1257 = vmatpush1.bf16.msra.mxu1 (!%p1142_p5), %v1437_v7 }
  0xdb   : > { %725 = vmatprep.subr.bf16.mxu0 (!%p1142_p5), %v1438_v8  ;;  %1250 = vmatprep.subr.bf16.mxu1 (!%p1142_p5), %v1438_v8 }
  0xde   : > { %726 = vmatpush1.bf16.msra.mxu0 (!%p1142_p5), %v1440_v9  ;;  %1258 = vmatpush1.bf16.msra.mxu1 (!%p1142_p5), %v1440_v9 }
  0xdf   : > { %727 = vmatprep.subr.bf16.mxu0 (!%p1142_p5), %v1441_v10  ;;  %1251 = vmatprep.subr.bf16.mxu1 (!%p1142_p5), %v1441_v10 }
  0xe2   : > { %728 = vmatpush1.bf16.msra.mxu0 (!%p1142_p5), %v1443_v11  ;;  %1259 = vmatpush1.bf16.msra.mxu1 (!%p1142_p5), %v1443_v11 }
  0xe3   : > { %729 = vmatprep.subr.bf16.mxu0 (!%p1142_p5), %v1444_v12  ;;  %1252 = vmatprep.subr.bf16.mxu1 (!%p1142_p5), %v1444_v12 }
  0xe6   : > { %730 = vmatpush1.bf16.msra.mxu0 (!%p1142_p5), %v1446_v13  ;;  %1260 = vmatpush1.bf16.msra.mxu1 (!%p1142_p5), %v1446_v13 }
  0xe7   : > { %731 = vmatprep.subr.bf16.mxu0 (!%p1142_p5), %v1447_v14  ;;  %1253 = vmatprep.subr.bf16.mxu1 (!%p1142_p5), %v1447_v14 }
  0xea   : > { %732 = vmatpush1.bf16.msra.mxu0 (!%p1142_p5), %v1449_v15  ;;  %1261 = vmatpush1.bf16.msra.mxu1 (!%p1142_p5), %v1449_v15 }
  0xeb   : > { %733 = vmatprep.subr.bf16.mxu0 (!%p1142_p5), %v1450_v16  ;;  %1254 = vmatprep.subr.bf16.mxu1 (!%p1142_p5), %v1450_v16 }
 0x1a3   : > { %v1217_v21 = vpop.f32.mrb[0].mxu0  ;;  %v1225_v22 = vpop.f32.mrb[0].mxu1 }
 0x1a4   : > { %v553_v25 = vadd.f32 %v1217_v21, %v312_v17  ;;  %v561_v26 = vadd.f32 %v1225_v22, %v320_v18  ;;  %v488_v27 = vpop.f32.mrb[1].mxu0  ;;  %v520_v28 = vpop.f32.mrb[1].mxu1  ;;  %v1452_v17 = vld [vmem:[#allocation8 + $0x70] ss:$8 sps:$4 sm:$0xff] (!%p1142_p5)  }
 0x1a5   : > { %v551_v31 = vadd.f32 %v488_v27, %v310_v19  ;;  %v559_v32 = vadd.f32 %v520_v28, %v318_v20  ;;  %v1218_v33 = vpop.f32.mrb[2].mxu0  ;;  %v1226_v34 = vpop.f32.mrb[2].mxu1  ;;  %734 = vmatpush1.bf16.msra.mxu0 (!%p1142_p5), %v1452_v17  ;;  %1262 = vmatpush1.bf16.msra.mxu1 (!%p1142_p5), %v1452_v17 }
 0x1a6   : > { %569 = vst [vmem:[#allocation2 + $0x10] sm:$0xff] %v553_v25  ;;  %577 = vst [vmem:[#allocation2 + $0x50] sm:$0xff] %v561_v26  ;;  %v554_v35 = vadd.f32 %v1218_v33, %v313_v23  ;;  %v562_v36 = vadd.f32 %v1226_v34, %v321_v24  ;;  %v491_v37 = vpop.f32.mrb[3].mxu0  ;;  %v523_v38 = vpop.f32.mrb[3].mxu1 }
 0x1a7   : > { %567 = vst [vmem:[#allocation2] sm:$0xff] %v551_v31  ;;  %575 = vst [vmem:[#allocation2 + $0x40] sm:$0xff] %v559_v32  ;;  %v552_v39 = vadd.f32 %v491_v37, %v311_v29  ;;  %v560_v40 = vadd.f32 %v523_v38, %v319_v30 }
 0x1a8   : > { %570 = vst [vmem:[#allocation2 + $0x18] sm:$0xff] %v554_v35  ;;  %578 = vst [vmem:[#allocation2 + $0x58] sm:$0xff] %v562_v36 }
 0x1a9   : > { %568 = vst [vmem:[#allocation2 + $0x8] sm:$0xff] %v552_v39  ;;  %576 = vst [vmem:[#allocation2 + $0x48] sm:$0xff] %v560_v40 }
 0x1ab   : > { %v1221_v45 = vpop.f32.mrb[4].mxu0  ;;  %v1229_v46 = vpop.f32.mrb[4].mxu1  ;;  %586 = sbr.rel (%p1142_p5) target bundleno = 717 (0x2cd), region = 56 }
 0x1ac   : > { %v557_v49 = vadd.f32 %v1221_v45, %v316_v41  ;;  %v565_v50 = vadd.f32 %v1229_v46, %v324_v42  ;;  %v504_v51 = vpop.f32.mrb[5].mxu0  ;;  %v536_v52 = vpop.f32.mrb[5].mxu1  ;;  %v629_v42 = vlaneseq (!%p1142_p5)  ;;  %v627_v45 = vld [vmem:[%s2379_s16] sm:$0x3] (!%p1142_p5) }
 0x1ad   : > { %v555_v55 = vadd.f32 %v504_v51, %v314_v43  ;;  %v563_v56 = vadd.f32 %v536_v52, %v322_v44  ;;  %v1222_v57 = vpop.f32.mrb[6].mxu0  ;;  %v1230_v58 = vpop.f32.mrb[6].mxu1  ;;  %v589_v24 = vld [vmem:[#allocation2 + $0x10] sm:$0xff] (!%p1142_p5) }
 0x1ae   : > { %573 = vst [vmem:[#allocation2 + $0x30] sm:$0xff] %v557_v49  ;;  %581 = vst [vmem:[#allocation2 + $0x70] sm:$0xff] %v565_v50  ;;  %v558_v59 = vadd.f32 %v1222_v57, %v317_v47  ;;  %v566_v60 = vadd.f32 %v1230_v58, %v325_v48  ;;  %v507_v61 = vpop.f32.mrb[7].mxu0  ;;  %v539_v62 = vpop.f32.mrb[7].mxu1  ;;  %v587_v18 = vld [vmem:[#allocation2] sm:$0xff] (!%p1142_p5)  ;;  %v597_v26 = vld [vmem:[#allocation2 + $0x50] sm:$0xff] (!%p1142_p5) }
 0x1af   : > { %571 = vst [vmem:[#allocation2 + $0x20] sm:$0xff] %v555_v55  ;;  %579 = vst [vmem:[#allocation2 + $0x60] sm:$0xff] %v563_v56  ;;  %v556_v63 = vadd.f32 %v507_v61, %v315_v53  ;;  %v564_v0 = vadd.f32 %v539_v62, %v323_v54  ;;  %v595_v20 = vld [vmem:[#allocation2 + $0x40] sm:$0xff] (!%p1142_p5)  ;;  %v590_v25 = vld [vmem:[#allocation2 + $0x18] sm:$0xff] (!%p1142_p5)  ;;  %v630_v43 = vshrl.u32 (!%p1142_p5), %v629_v42, 7 }
 0x1b0   : > { %574 = vst [vmem:[#allocation2 + $0x38] sm:$0xff] %v558_v59  ;;  %582 = vst [vmem:[#allocation2 + $0x78] sm:$0xff] %v566_v60  ;;  %v588_v19 = vld [vmem:[#allocation2 + $0x8] sm:$0xff] (!%p1142_p5)  ;;  %v598_v27 = vld [vmem:[#allocation2 + $0x58] sm:$0xff] (!%p1142_p5)  ;;  %v604_v28 = vpack.c.bf16 (!%p1142_p5), %v590_v25, %v589_v24 }
 0x1b1   : > { %572 = vst [vmem:[#allocation2 + $0x28] sm:$0xff] %v556_v63  ;;  %580 = vst [vmem:[#allocation2 + $0x68] sm:$0xff] %v564_v0  ;;  %v596_v21 = vld [vmem:[#allocation2 + $0x48] sm:$0xff] (!%p1142_p5)  ;;  %v603_v22 = vpack.c.bf16 (!%p1142_p5), %v588_v19, %v587_v18  ;;  %v608_v29 = vpack.c.bf16 (!%p1142_p5), %v598_v27, %v597_v26  ;;  %v631_v44 = vsub.s32 (!%p1142_p5), 0, %v630_v43  ;;  %v635_v46 = vsub.s32 (!%p1142_p5), 1, %v630_v43 }
 0x1b2   : > { %v607_v23 = vpack.c.bf16 %v596_v21, %v595_v20 }
 0x1b3   : > { %752 = vmatmul.mubr.bf16.vlgmr.msra.gmra.mrb[0].mxu0 %v603_v22  ;;  %v2156_v47 = vrot.slane %v627_v45, %v631_v44  ;;  %v2158_v48 = vrot.slane %v627_v45, %v635_v46 }
 0x1b4   : > { %792 = vmatmul.mubr.bf16.vlgmr.msra.gmra.mrb[0].mxu1 %v607_v23  ;;  %761 = vmatprep.mubr.bf16.mxu0 %v1801_v3 }
 0x1b5   : > { %801 = vmatprep.mubr.bf16.mxu1 %v1801_v3  ;;  %v593_v36 = vld [vmem:[#allocation2 + $0x30] sm:$0xff] }
 0x1b6   : > { %v591_v30 = vld [vmem:[#allocation2 + $0x20] sm:$0xff]  ;;  %v601_v38 = vld [vmem:[#allocation2 + $0x70] sm:$0xff] }
 0x1b7   : > { %v599_v32 = vld [vmem:[#allocation2 + $0x60] sm:$0xff]  ;;  %v594_v37 = vld [vmem:[#allocation2 + $0x38] sm:$0xff] }
 0x1b8   : > { %v592_v31 = vld [vmem:[#allocation2 + $0x28] sm:$0xff]  ;;  %v602_v39 = vld [vmem:[#allocation2 + $0x78] sm:$0xff]  ;;  %v606_v40 = vpack.c.bf16 %v594_v37, %v593_v36 }
 0x1b9   : > { %v600_v33 = vld [vmem:[#allocation2 + $0x68] sm:$0xff]  ;;  %v605_v34 = vpack.c.bf16 %v592_v31, %v591_v30  ;;  %v610_v41 = vpack.c.bf16 %v602_v39, %v601_v38 }
 0x1ba   : > { %v609_v35 = vpack.c.bf16 %v600_v33, %v599_v32 }
 0x1bb   : > { %762 = vmatmul.mubr.bf16.gmra.mrb[4].mxu0 %v604_v28 }
 0x1bc   : > { %802 = vmatmul.mubr.bf16.gmra.mrb[4].mxu1 %v608_v29  ;;  %771 = vmatprep.mubr.bf16.mxu0 %v1801_v3 }
 0x1bd   : > { %811 = vmatprep.mubr.bf16.mxu1 %v1801_v3 }
 0x1c3   : > { %772 = vmatmul.mubr.bf16.gmra.mrb[8].mxu0 %v605_v34 }
 0x1c4   : > { %812 = vmatmul.mubr.bf16.gmra.mrb[8].mxu1 %v609_v35  ;;  %781 = vmatprep.mubr.bf16.mxu0 %v1801_v3 }
 0x1c5   : > { %821 = vmatprep.mubr.bf16.mxu1 %v1801_v3 }
 0x1cb   : > { %782 = vmatmul.mubr.bf16.gmra.mrb[12].mxu0 %v606_v40 }
 0x1cc   : > { %822 = vmatmul.mubr.bf16.gmra.mrb[12].mxu1 %v610_v41 }
 0x286   : > { %v753_v49 = vpop.f32.mrb[0].mxu0 }
 0x287   : > { %v793_v50 = vpop.f32.mrb[0].mxu1  ;;  %v754_v51 = vadd.f32 %v753_v49, %v2156_v47  ;;  %v755_v53 = vpop.f32.mrb[1].mxu0 }
 0x288   : > { %v794_v52 = vadd.f32 %v793_v50, %v2156_v47  ;;  %v795_v54 = vpop.f32.mrb[1].mxu1  ;;  %v756_v55 = vadd.f32 %v755_v53, %v2158_v48  ;;  %v757_v57 = vpop.f32.mrb[2].mxu0 }
 0x289   : > { %v796_v56 = vadd.f32 %v795_v54, %v2158_v48  ;;  %v797_v58 = vpop.f32.mrb[2].mxu1  ;;  %v1159_v59 = vmul.f32 -1.442695, %v754_v51  ;;  %v758_v61 = vadd.f32 %v757_v57, %v2156_v47  ;;  %v759_v63 = vpop.f32.mrb[3].mxu0 }
 0x28a   : > { %v1167_v60 = vmul.f32 -1.442695, %v794_v52  ;;  %v798_v62 = vadd.f32 %v797_v58, %v2156_v47  ;;  %v799_v0 = vpop.f32.mrb[3].mxu1  ;;  %1453 = vtanh.f32 %v756_v55  ;;  %v760_v3 = vadd.f32 %v759_v63, %v2158_v48 }
 0x28b   : > { %1455 = vpow2.f32 %v1159_v59  ;;  %v1160_v1 = vmul.f32 -1.442695, %v758_v61  ;;  %v800_v4 = vadd.f32 %v799_v0, %v2158_v48 }
 0x28c   : > { %v1168_v2 = vmul.f32 -1.442695, %v798_v62  ;;  %1457 = vpow2.f32 %v1167_v60 }
 0x28d   : > { %1459 = vtanh.f32 %v796_v56 }
 0x28e   : > { %1461 = vpow2.f32 %v1160_v1  ;;  %v763_v5 = vpop.f32.mrb[4].mxu0 }
 0x28f   : > { %v803_v6 = vpop.f32.mrb[4].mxu1  ;;  %1463 = vpow2.f32 %v1168_v2  ;;  %v764_v7 = vadd.f32 %v763_v5, %v2156_v47  ;;  %v765_v9 = vpop.f32.mrb[5].mxu0 }
 0x290   : > { %v804_v8 = vadd.f32 %v803_v6, %v2156_v47  ;;  %v805_v10 = vpop.f32.mrb[5].mxu1  ;;  %1465 = vtanh.f32 %v760_v3  ;;  %v767_v11 = vpop.f32.mrb[6].mxu0  ;;  %v766_v15 = vadd.f32 %v765_v9, %v2158_v48 }
 0x291   : > { %v807_v12 = vpop.f32.mrb[6].mxu1  ;;  %v1161_v13 = vmul.f32 -1.442695, %v764_v7  ;;  %v768_v16 = vadd.f32 %v767_v11, %v2156_v47  ;;  %v769_v17 = vpop.f32.mrb[7].mxu0  ;;  %1467 = vtanh.f32 %v800_v4  ;;  %v806_v26 = vadd.f32 %v805_v10, %v2158_v48 }
 0x292   : > { %v1169_v14 = vmul.f32 -1.442695, %v804_v8  ;;  %v809_v18 = vpop.f32.mrb[7].mxu1  ;;  %v808_v19 = vadd.f32 %v807_v12, %v2156_v47  ;;  %v770_v40 = vadd.f32 %v769_v17, %v2158_v48 }
 0x293   : > { %1469 = vpow2.f32 %v1161_v13  ;;  %v1162_v20 = vmul.f32 -1.442695, %v768_v16  ;;  %v810_v53 = vadd.f32 %v809_v18, %v2158_v48 }
 0x294   : > { %v2173_v21 = vpop.eup %1453  ;;  %1471 = vpow2.f32 %v1169_v14  ;;  %v1170_v22 = vmul.f32 -1.442695, %v808_v19 }
 0x295   : > { %v1456_v23 = vpop.eup %1455  ;;  %1473 = vtanh.f32 %v766_v15 }
 0x296   : > { %v1458_v24 = vpop.eup %1457  ;;  %v880_v25 = vadd.f32 1.0, %v1456_v23  ;;  %1475 = vpow2.f32 %v1162_v20  ;;  %v773_v27 = vpop.f32.mrb[8].mxu0 }
 0x297   : > { %v813_v28 = vpop.f32.mrb[8].mxu1  ;;  %v1460_v29 = vpop.eup %1459  ;;  %v888_v30 = vadd.f32 1.0, %v1458_v24  ;;  %1477 = vpow2.f32 %v1170_v22  ;;  %v774_v31 = vadd.f32 %v773_v27, %v2156_v47 }
 0x298   : > { %v814_v32 = vadd.f32 %v813_v28, %v2156_v47  ;;  %v775_v33 = vpop.f32.mrb[9].mxu0  ;;  %v815_v34 = vpop.f32.mrb[9].mxu1  ;;  %1479 = vrcp.f32 %v880_v25 }
 0x299   : > { %v1462_v35 = vpop.eup %1461  ;;  %v777_v36 = vpop.f32.mrb[10].mxu0  ;;  %1481 = vrcp.f32 %v888_v30  ;;  %v1163_v44 = vmul.f32 -1.442695, %v774_v31  ;;  %v776_v14 = vadd.f32 %v775_v33, %v2158_v48  ;;  %v816_v16 = vadd.f32 %v815_v34, %v2158_v48 }
 0x29a   : > { %v817_v37 = vpop.f32.mrb[10].mxu1  ;;  %v1464_v38 = vpop.eup %1463  ;;  %v881_v39 = vadd.f32 1.0, %v1462_v35  ;;  %1483 = vtanh.f32 %v806_v26  ;;  %v1171_v46 = vmul.f32 -1.442695, %v814_v32  ;;  %v778_v54 = vadd.f32 %v777_v36, %v2156_v47 }
 0x29b   : > { %v2179_v41 = vpop.f32.mrb[11].mxu0  ;;  %v1466_v42 = vpop.eup %1465  ;;  %v889_v43 = vadd.f32 1.0, %v1464_v38  ;;  %v818_v59 = vadd.f32 %v817_v37, %v2156_v47 }
 0x29c   : > { %v2181_v45 = vpop.f32.mrb[11].mxu1  ;;  %1485 = vrcp.f32 %v881_v39  ;;  %v1468_v49 = vpop.eup %1467  ;;  %v1164_v6 = vmul.f32 -1.442695, %v778_v54  ;;  %v780_v33 = vadd.f32 %v2179_v41, %v2158_v48 }
 0x29d   : > { %1487 = vrcp.f32 %v889_v43  ;;  %v1470_v50 = vpop.eup %1469  ;;  %v1172_v11 = vmul.f32 -1.442695, %v818_v59 }
 0x29e   : > { %1489 = vtanh.f32 %v770_v40  ;;  %v1472_v51 = vpop.eup %1471  ;;  %v882_v52 = vadd.f32 1.0, %v1470_v50  ;;  %v783_v55 = vpop.f32.mrb[12].mxu0  ;;  %v820_v40 = vadd.f32 %v2181_v45, %v2158_v48 }
 0x29f   : > { %1491 = vpow2.f32 %v1163_v44  ;;  %v823_v56 = vpop.f32.mrb[12].mxu1  ;;  %v1474_v57 = vpop.eup %1473  ;;  %v890_v58 = vadd.f32 1.0, %v1472_v51  ;;  %v784_v7 = vadd.f32 %v783_v55, %v2156_v47 }
 0x2a0   : > { %1493 = vpow2.f32 %v1171_v46  ;;  %v2186_v60 = vpop.f32.mrb[13].mxu0  ;;  %v2188_v61 = vpop.f32.mrb[13].mxu1  ;;  %v824_v17 = vadd.f32 %v823_v56, %v2156_v47 }
 0x2a1   : > { %v1476_v62 = vpop.eup %1475  ;;  %1495 = vrcp.f32 %v882_v52  ;;  %v787_v63 = vpop.f32.mrb[14].mxu0  ;;  %v1165_v20 = vmul.f32 -1.442695, %v784_v7  ;;  %v786_v50 = vadd.f32 %v2186_v60, %v2158_v48  ;;  %v826_v54 = vadd.f32 %v2188_v61, %v2158_v48 }
 0x2a2   : > { %v827_v0 = vpop.f32.mrb[14].mxu1  ;;  %v1478_v1 = vpop.eup %1477  ;;  %1497 = vrcp.f32 %v890_v58  ;;  %v883_v2 = vadd.f32 1.0, %v1476_v62  ;;  %v788_v24 = vadd.f32 %v787_v63, %v2156_v47  ;;  %v1173_v27 = vmul.f32 -1.442695, %v824_v17 }
 0x2a3   : > { %v2190_v3 = vpop.f32.mrb[15].mxu0  ;;  %v1480_v4 = vpop.eup %1479  ;;  %v891_v5 = vadd.f32 1.0, %v1478_v1  ;;  %1499 = vtanh.f32 %v810_v53  ;;  %v828_v28 = vadd.f32 %v827_v0, %v2156_v47 }
 0x2a4   : > { %v2193_v8 = vpop.f32.mrb[15].mxu1  ;;  %v1482_v9 = vpop.eup %1481  ;;  %v944_v10 = vmul.f32 %v1480_v4, %v2173_v21  ;;  %1501 = vrcp.f32 %v883_v2  ;;  %v1166_v36 = vmul.f32 -1.442695, %v788_v24  ;;  %v790_v59 = vadd.f32 %v2190_v3, %v2158_v48 }
 0x2a5   : > { %v1484_v12 = vpop.eup %1483  ;;  %v952_v13 = vmul.f32 %v1482_v9, %v1460_v29  ;;  %1503 = vrcp.f32 %v891_v5  ;;  %v1174_v47 = vmul.f32 -1.442695, %v828_v28  ;;  %v830_v62 = vadd.f32 %v2193_v8, %v2158_v48 }
 0x2a6   : > { %v1486_v15 = vpop.eup %1485  ;;  %960 = vst [vmem:[%s2125_s5] sm:$0xff] %v944_v10  ;;  %1505 = vpow2.f32 %v1164_v6 }
 0x2a7   : > { %v1488_v18 = vpop.eup %1487  ;;  %968 = vst [vmem:[%s2125_s5 + $0x40] sm:$0xff] %v952_v13  ;;  %v945_v19 = vmul.f32 %v1486_v15, %v1466_v42  ;;  %1507 = vpow2.f32 %v1172_v11 }
 0x2a8   : > { %v1490_v21 = vpop.eup %1489  ;;  %v953_v22 = vmul.f32 %v1488_v18, %v1468_v49  ;;  %1509 = vtanh.f32 %v776_v14 }
 0x2a9   : > { %v1492_v23 = vpop.eup %1491  ;;  %961 = vst [vmem:[%s2125_s5 + $0x8] sm:$0xff] %v945_v19  ;;  %1511 = vtanh.f32 %v816_v16 }
 0x2aa   : > { %v1494_v25 = vpop.eup %1493  ;;  %969 = vst [vmem:[%s2125_s5 + $0x48] sm:$0xff] %v953_v22  ;;  %v884_v26 = vadd.f32 1.0, %v1492_v23  ;;  %1513 = vpow2.f32 %v1165_v20 }
 0x2ab   : > { %v1496_v29 = vpop.eup %1495  ;;  %v892_v30 = vadd.f32 1.0, %v1494_v25 }
 0x2ac   : > { %v1498_v31 = vpop.eup %1497  ;;  %v946_v32 = vmul.f32 %v1496_v29, %v1474_v57  ;;  %1515 = vrcp.f32 %v884_v26 }
 0x2ad   : > { %v1500_v34 = vpop.eup %1499  ;;  %v954_v35 = vmul.f32 %v1498_v31, %v1484_v12  ;;  %1517 = vrcp.f32 %v892_v30 }
 0x2ae   : > { %v1502_v37 = vpop.eup %1501  ;;  %962 = vst [vmem:[%s2125_s5 + $0x10] sm:$0xff] %v946_v32  ;;  %1519 = vpow2.f32 %v1173_v27 }
 0x2af   : > { %v1504_v38 = vpop.eup %1503  ;;  %970 = vst [vmem:[%s2125_s5 + $0x50] sm:$0xff] %v954_v35  ;;  %v947_v39 = vmul.f32 %v1502_v37, %v1490_v21  ;;  %1521 = vtanh.f32 %v780_v33 }
 0x2b0   : > { %v955_v42 = vmul.f32 %v1504_v38, %v1500_v34  ;;  %v1506_v43 = vpop.eup %1505  ;;  %1523 = vpow2.f32 %v1166_v36 }
 0x2b1   : > { %963 = vst [vmem:[%s2125_s5 + $0x18] sm:$0xff] %v947_v39  ;;  %v1508_v41 = vpop.eup %1507  ;;  %v885_v44 = vadd.f32 1.0, %v1506_v43  ;;  %1525 = vpow2.f32 %v1174_v47 }
 0x2b2   : > { %971 = vst [vmem:[%s2125_s5 + $0x58] sm:$0xff] %v955_v42  ;;  %v1510_v46 = vpop.eup %1509  ;;  %v893_v49 = vadd.f32 1.0, %v1508_v41  ;;  %1527 = vtanh.f32 %v820_v40 }
 0x2b3   : > { %v1512_v51 = vpop.eup %1511  ;;  %1529 = vrcp.f32 %v885_v44 }
 0x2b4   : > { %v1514_v52 = vpop.eup %1513  ;;  %1531 = vrcp.f32 %v893_v49 }
 0x2b5   : > { %v886_v53 = vadd.f32 1.0, %v1514_v52  ;;  %1533 = vtanh.f32 %v786_v50 }
 0x2b6   : > { %v1516_v45 = vpop.eup %1515 }
 0x2b7   : > { %v1518_v55 = vpop.eup %1517  ;;  %v948_v56 = vmul.f32 %v1516_v45, %v1510_v46  ;;  %1535 = vrcp.f32 %v886_v53 }
 0x2b8   : > { %v1520_v57 = vpop.eup %1519  ;;  %v956_v58 = vmul.f32 %v1518_v55, %v1512_v51  ;;  %1537 = vtanh.f32 %v826_v54 }
 0x2b9   : > { %964 = vst [vmem:[%s2125_s5 + $0x20] sm:$0xff] %v948_v56  ;;  %v894_v60 = vadd.f32 1.0, %v1520_v57  ;;  %v1522_v63 = vpop.eup %1521 }
 0x2ba   : > { %972 = vst [vmem:[%s2125_s5 + $0x60] sm:$0xff] %v956_v58  ;;  %v1524_v0 = vpop.eup %1523 }
 0x2bb   : > { %1539 = vrcp.f32 %v894_v60  ;;  %v1526_v61 = vpop.eup %1525  ;;  %v887_v1 = vadd.f32 1.0, %v1524_v0 }
 0x2bc   : > { %1541 = vtanh.f32 %v790_v59  ;;  %v1528_v2 = vpop.eup %1527  ;;  %v895_v4 = vadd.f32 1.0, %v1526_v61 }
 0x2bd   : > { %1543 = vtanh.f32 %v830_v62  ;;  %v1530_v3 = vpop.eup %1529 }
 0x2be   : > { %1545 = vrcp.f32 %v887_v1  ;;  %v1532_v5 = vpop.eup %1531  ;;  %v949_v6 = vmul.f32 %v1530_v3, %v1522_v63 }
 0x2bf   : > { %1547 = vrcp.f32 %v895_v4  ;;  %v957_v48 = vmul.f32 %v1532_v5, %v1528_v2  ;;  %v1534_v7 = vpop.eup %1533 }
 0x2c0   : > { %965 = vst [vmem:[%s2125_s5 + $0x28] sm:$0xff] %v949_v6 }
 0x2c1   : > { %v1536_v8 = vpop.eup %1535  ;;  %973 = vst [vmem:[%s2125_s5 + $0x68] sm:$0xff] %v957_v48 }
 0x2c2   : > { %v950_v9 = vmul.f32 %v1536_v8, %v1534_v7  ;;  %v1538_v10 = vpop.eup %1537 }
 0x2c4   : > { %966 = vst [vmem:[%s2125_s5 + $0x30] sm:$0xff] %v950_v9 }
 0x2c5   : > { %v1540_v11 = vpop.eup %1539 }
 0x2c6   : > { %v1542_v12 = vpop.eup %1541  ;;  %v958_v13 = vmul.f32 %v1540_v11, %v1538_v10 }
 0x2c7   : > { %v1544_v14 = vpop.eup %1543 }
 0x2c8   : > { %v1546_v15 = vpop.eup %1545  ;;  %974 = vst [vmem:[%s2125_s5 + $0x70] sm:$0xff] %v958_v13 }
 0x2c9   : > { %v1548_v16 = vpop.eup %1547  ;;  %v951_v17 = vmul.f32 %v1546_v15, %v1542_v12 }
 0x2ca   : > { %v959_v18 = vmul.f32 %v1548_v16, %v1544_v14 }
 0x2cb   : > { %967 = vst [vmem:[%s2125_s5 + $0x38] sm:$0xff] %v951_v17 }
 0x2cc   : > { %975 = vst [vmem:[%s2125_s5 + $0x78] sm:$0xff] %v959_v18 }
 0x2cd PF: > { %s2380_s25 = sld [smem:[#allocation17_spill]]  ;;  %s2382_s13 = sld [smem:[#allocation20_spill]] }
 0x2ce   : > { %s2383_s14 = sld [smem:[#allocation26_spill]]  ;;  %s990_s8 = sshll.u32 %s2125_s5, 4  ;;  %s2236_s8 = int_to_ptr.vmem [resolvable:$true] %s990_s8 }
 0x2cf   : > { %s2240_s6 = scalar_lea.sflag [#allocation5], %s283_s29  ;;  %s1637_s2 = scalar_lea.vmem %s2236_s8, 2048 }
 0x2d0   : > { %p1638_p2 = scmp.ne.s32.totalorder %s2236_s8, %s1637_s2  ;;  %s1802_s9 = smov [#allocation9]  }
 0x2d1   : > { %s1641_s15 = sshll.u32 %s1802_s9, 4  ;;  %s1642_s15 = int_to_ptr.vmem [resolvable:$false] %s1641_s15 }
 0x2d2   : > { %s1643_s24 = scalar_lea.vmem %s1642_s15, 4096  ;;  %p1644_p4 = scmp.lt.s32.totalorder %s2236_s8, %s1642_s15 }
 0x2d3   : > { %s1182_s12 = sshll.u32 %s2380_s25, 11  ;;  %p2384_p10 = scmp.ne.s32.totalorder %s2382_s13, 0 }
 0x2d4   : > { %s2233_s10 = scalar_lea.hbm %s2383_s14, %s1182_s12  ;;  %p1645_p8 = scmp.lt.s32.totalorder %s1643_s24, %s1637_s2 }
 0x2d5   : > { %p1639_p7 = pnand %p1638_p2, %p2384_p10 }
 0x2d6   : > { %p1646_p12 = por %p1645_p8, %p1644_p4 }
 0x2d7   : > { %p1640_p0 = pneg %p1639_p7 }
 0x2d9   : > { %p1647_p13 = pnand %p1646_p12, %p1640_p0 }
 0x2db   : > { %1650 = shalt.err (!%p1647_p13)
}
 0x2dc   : > { %s1651_s29 = scalar_lea.hbm %s2233_s10, 2048  ;;  %s1655_s16 = scalar_lea.hbm %s2383_s14, 4096 }
 0x2dd   : > { %p1652_p6 = scmp.ne.s32.totalorder %s2233_s10, %s1651_s29  ;;  %p1656_p3 = scmp.lt.u32.totalorder %s2233_s10, %s2383_s14 }
 0x2de   : > { %p1657_p9 = scmp.lt.u32.totalorder %s1655_s16, %s1651_s29  ;;  %p1659_p2 = scmp.lt.u32.totalorder %s1651_s29, %s2233_s10 }
 0x2df   : > { %p1653_p11 = pnand %p1652_p6, %p2384_p10 }
 0x2e0   : > { %p1658_p5 = por %p1657_p9, %p1656_p3 }
 0x2e1   : > { %p1654_p1 = pneg %p1653_p11 }
 0x2e2   : > { %p1660_p7 = por %p1659_p2, %p1658_p5 }
 0x2e4   : > { %p1661_p0 = pnand %p1660_p7, %p1654_p1 }
 0x2e6   : > { %1664 = shalt.err (!%p1661_p0)
}
 0x2e7   : > { %s1803_s12 = smov 128   ;;  %s1804_s11 = smov 8  }
 0x2e8   : > { %1271 = dma.vmem_to_hbm [thread:$0]  (%p2384_p10), %s2236_s8, 2048, %s2233_s10, %s2240_s6, %s1803_s12, %s1803_s12, %s1804_s11  }
 0x2e9 PF: > { %s2385_s0 = sld [smem:[#allocation14_spill]]  ;;  %s2386_s2 = sld [smem:[#allocation21_spill]] }
 0x2ea   : > { %p1291_p4 = scmp.ge.s32.totalorder %s1791_s28, 2 }
 0x2ef   : > { %s1005_s9 = sand.u32 1, %s2385_s0   ;;  %p2387_p8 = scmp.ne.s32.totalorder %s2386_s2, 0 }
 0x2f0   : > { %s1006_s15 = scalar_lea.sflag [#allocation5], %s1005_s9 }
 0x2f1   : > { %p1285_p12 = pnand %p1291_p4, %p2387_p8 }
 0x2f3   : > { %1734 = dma.done.wait (!%p1285_p12), %s1006_s15, 2048  }
 0x2f4   : > { %1736 = vsyncadd (!%p1285_p12), %s1006_s15, 4294965248  ;;  %s23_s28 = sadd.s32 1, %s1791_s28   ;;  %s2389_s15 = sld [smem:[#allocation15_spill]] }
 0x2f5   : > { %p2269_p13 = scmp.ge.s32.totalorder %s23_s28, 6   ;;  %s2390_s13 = sld [smem:[#allocation22_spill]] }
 0x2f6   : > { %s2391_s10 = smov %s2410_s21  ;;  %s2393_s16 = smov %s1747_s17 }
 0x2f7   : > { %s2394_s17 = smov %s1992_s18  ;;  %s2395_s18 = smov %s1755_s19 }
 0x2f8   : > { %s2396_s19 = smov %s1759_s20  ;;  %s2397_s20 = smov %s2050_s7 }
 0x2f9   : > { %s2398_s21 = smov %s1767_s22  ;;  %s2399_s22 = smov %s1771_s23 }
 0x2fa   : > { %s2400_s23 = smov %s1995_s4  ;;  %s2401_s24 = smov %s1783_s26 }
 0x2fb   : > { %s2402_s25 = smov %s1787_s27  ;;  %s2403_s26 = smov %s2390_s13 }
 0x2fc   : > { %s2404_s27 = smov %s2391_s10  ;;  %22 = sbr.rel (!%p2269_p13) target bundleno = 17 (0x11), region = 106 }
 0x303   :  { %1011 = vsyncpa [#allocation4], 1 }
 0x304   :  { %1013 = vsyncpa [#allocation4 + $0x1], 1 }
 0x305   :  { %1014 = vsyncpa [#allocation7], 1 }
 0x306   :  { %1016 = vsyncpa [#allocation7 + $0x1], 1 }
 0x307   :  { %1017 = vsyncpa [#allocation5], 1 }
 0x308   :  { %1019 = vsyncpa [#allocation5 + $0x1], 1 }

</bundles_post_ra>
